<compile_context>
chip_gen: v5e
topology: v5e:2x2
jax: 0.10.0
libtpu: 0.0.40
codegen_flags: <defaults>
</compile_context>

<pallas_src>
import jax
import jax.numpy as jnp
from jax.experimental import pallas as pl
from jax.experimental.pallas import tpu as pltpu


# ----------------------------- Pallas kernel ---------------------------------

def saf_kernel(low_ref, high_ref, w1l_ref, w1h_ref, b1_ref, w2_ref, b2_ref, o_ref):
    # low_ref:  (1, Cl, TN)   high_ref: (1, Ch, TN)
    # w1l_ref:  (Ci, Cl)      w1h_ref:  (Ci, Ch)     b1_ref: (Ci, 1)
    # w2_ref:   (C, Ci)       b2_ref:   (C, 1)       o_ref:  (1, C, TN), C = Cl + Ch
    low = low_ref[0].astype(jnp.float32)      # (Cl, TN)
    high = high_ref[0].astype(jnp.float32)    # (Ch, TN)
    cl = low.shape[0]

    # Conv1x1 #1 (+ folded BN1) with the channel concat fused via split weights, then ReLU.
    h1 = (jnp.dot(w1l_ref[...], low, preferred_element_type=jnp.float32)
          + jnp.dot(w1h_ref[...], high, preferred_element_type=jnp.float32)
          + b1_ref[...])
    h1 = jnp.maximum(h1, 0.0)                                                   # (Ci, TN)

    # Conv1x1 #2 (+ folded BN2).
    xl = jnp.dot(w2_ref[...], h1, preferred_element_type=jnp.float32) + b2_ref[...]  # (C, TN)

    # sigmoid gate (EUP exp + approx reciprocal) and elementwise multiply with xa.
    wei = pl.reciprocal(1.0 + jnp.exp(-xl), approx=True)
    o_ref[0, :cl, :] = (low * wei[:cl, :]).astype(o_ref.dtype)
    o_ref[0, cl:, :] = (high * wei[cl:, :]).astype(o_ref.dtype)


def saf_pallas(low_flat, high_flat, w1l, w1h, b1, w2, b2, tn=512):
    # low_flat: (N, Cl, M), high_flat: (N, Ch, M)   with M = H*W
    N, Cl, M = low_flat.shape
    _, Ch, _ = high_flat.shape
    C = Cl + Ch
    Ci = w1l.shape[0]

    # Spatial tile: big (amortizes the ~0.35us/step overhead, saturates HBM) and
    # lane-dense.  Small inputs use the full extent; ragged tails are masked by Pallas.
    if M <= tn:
        tn = M
    else:
        tn = max(128, (tn // 128) * 128)
    grid = (N, pl.cdiv(M, tn))

    return pl.pallas_call(
        saf_kernel,
        out_shape=jax.ShapeDtypeStruct((N, C, M), low_flat.dtype),
        grid_spec=pltpu.PrefetchScalarGridSpec(
            num_scalar_prefetch=0,
            grid=grid,
            in_specs=[
                pl.BlockSpec((1, Cl, tn), lambda n, j: (n, 0, j)),   # low-stage tile
                pl.BlockSpec((1, Ch, tn), lambda n, j: (n, 0, j)),   # upsampled high tile
                pl.BlockSpec((Ci, Cl), lambda n, j: (0, 0)),         # conv1 weight (low half, BN-folded)
                pl.BlockSpec((Ci, Ch), lambda n, j: (0, 0)),         # conv1 weight (high half, BN-folded)
                pl.BlockSpec((Ci, 1), lambda n, j: (0, 0)),          # conv1 bias (BN-folded)
                pl.BlockSpec((C, Ci), lambda n, j: (0, 0)),          # conv2 weight (BN-folded)
                pl.BlockSpec((C, 1), lambda n, j: (0, 0)),           # conv2 bias (BN-folded)
            ],
            out_specs=pl.BlockSpec((1, C, tn), lambda n, j: (n, 0, j)),
        ),
        compiler_params=pltpu.CompilerParams(
            dimension_semantics=("parallel", "parallel")),
    )(low_flat, high_flat, w1l, w1h, b1, w2, b2)


# ----------------------------- JAX glue ---------------------------------------

def interp_matrix(out_size, in_size, dtype=jnp.float32):
    """Row-interpolation matrix for bilinear resize with align_corners=True."""
    if out_size == 1:
        src = jnp.zeros((1,), dtype=jnp.float32)
    else:
        scale = (in_size - 1) / (out_size - 1)     # in_size == 1 -> scale 0 (valid)
        src = jnp.arange(out_size, dtype=jnp.float32) * scale
    i0 = jnp.clip(jnp.floor(src).astype(jnp.int32), 0, in_size - 1)
    i1 = jnp.clip(i0 + 1, 0, in_size - 1)
    frac = src - i0.astype(jnp.float32)
    R = (jax.nn.one_hot(i0, in_size, dtype=jnp.float32) * (1.0 - frac)[:, None]
         + jax.nn.one_hot(i1, in_size, dtype=jnp.float32) * frac[:, None])
    return R.astype(dtype)


def fold_bn(conv_w, conv_b, gamma, beta, mean, var, eps=1e-5):
    """Fold eval-mode BatchNorm into a 1x1 conv. conv_w: (Cout, Cin)."""
    s = gamma / jnp.sqrt(var + eps)                # (Cout,)
    w_f = conv_w * s[:, None]                      # (Cout, Cin)
    b_f = (conv_b - mean) * s + beta               # (Cout,)
    return w_f, b_f


def init_saf_params(key, cl, ch, r=4):
    channels = cl + ch
    inter = channels // r
    ks = jax.random.split(key, 12)
    # Conv2d(channels, inter, 1): weight (inter, channels, 1, 1) -> (inter, channels)
    w1 = 0.1 * jax.random.normal(ks[0], (inter, channels), jnp.float32)
    b1 = 0.1 * jax.random.normal(ks[1], (inter,), jnp.float32)
    g1 = 1.0 + 0.1 * jax.random.normal(ks[2], (inter,), jnp.float32)
    be1 = 0.1 * jax.random.normal(ks[3], (inter,), jnp.float32)
    m1 = 0.05 * jax.random.normal(ks[4], (inter,), jnp.float32)
    v1 = 1.0 + 0.1 * jnp.abs(jax.random.normal(ks[5], (inter,), jnp.float32))
    # Conv2d(inter, channels, 1)
    w2 = 0.1 * jax.random.normal(ks[6], (channels, inter), jnp.float32)
    b2 = 0.1 * jax.random.normal(ks[7], (channels,), jnp.float32)
    g2 = 1.0 + 0.1 * jax.random.normal(ks[8], (channels,), jnp.float32)
    be2 = 0.1 * jax.random.normal(ks[9], (channels,), jnp.float32)
    m2 = 0.05 * jax.random.normal(ks[10], (channels,), jnp.float32)
    v2 = 1.0 + 0.1 * jnp.abs(jax.random.normal(ks[11], (channels,), jnp.float32))

    w1f, b1f = fold_bn(w1, b1, g1, be1, m1, v1)    # (inter, channels), (inter,)
    w2f, b2f = fold_bn(w2, b2, g2, be2, m2, v2)    # (channels, inter), (channels,)

    # Kernel wants conv1 split at the concat boundary and biases as (Cout, 1) columns.
    return (w1f[:, :cl], w1f[:, cl:], b1f.reshape(inter, 1),
            w2f, b2f.reshape(channels, 1))


def saf_forward(high_stage, low_stage, params, tn=512):
    # high_stage: (N, Ch, hh, wh), low_stage: (N, Cl, h, w); NCHW like PyTorch.
    N, Cl, h, w = low_stage.shape
    _, Ch, hh, wh = high_stage.shape

    # Bilinear resize (align_corners=True) as two small matmuls (touches only the
    # smaller high_stage tensor; XLA glue).
    Rh = interp_matrix(h, hh)
    Rw = interp_matrix(w, wh)
    high_up = jnp.einsum('hp,ncpq,wq->nchw', Rh, high_stage, Rw)

    # Channels-first layout is kept: flattening H,W is a free reshape (no transpose,
    # no extra HBM pass), and the concat happens inside the kernel.
    low_flat = low_stage.reshape(N, Cl, h * w)
    high_flat = high_up.reshape(N, Ch, h * w)

    out_flat = saf_pallas(low_flat, high_flat, *params, tn=tn)
    return out_flat.reshape(N, Cl + Ch, h, w)


def saf_reference(high_stage, low_stage, params):
    """Pure-JAX f32 reference for validation (exact sigmoid)."""
    w1l, w1h, b1, w2, b2 = params
    N, Cl, h, w = low_stage.shape
    _, Ch, hh, wh = high_stage.shape
    Rh = interp_matrix(h, hh)
    Rw = interp_matrix(w, wh)
    high_up = jnp.einsum('hp,ncpq,wq->nchw', Rh, high_stage, Rw)
    xa = jnp.concatenate([low_stage, high_up], axis=1)             # (N, C, H, W)
    w1 = jnp.concatenate([w1l, w1h], axis=1)                       # (Ci, C)
    h1 = jnp.einsum('ic,nchw->nihw', w1, xa) + b1[:, 0][None, :, None, None]
    h1 = jnp.maximum(h1, 0.0)
    xl = jnp.einsum('ci,nihw->nchw', w2, h1) + b2[:, 0][None, :, None, None]
    return xa * jax.nn.sigmoid(xl)


# ----------------------------- main -------------------------------------------

if __name__ == "__main__":
    key = jax.random.PRNGKey(0)
    k_low, k_high, k_par = jax.random.split(key, 3)

    # Small shapes: channels = Cl + Ch = 16, r = 4 -> inter_channels = 4
    N, Cl, Ch = 2, 8, 8
    H, W = 16, 16           # low-stage spatial size
    Hh, Wh = 8, 8           # high-stage spatial size (upsampled to (H, W))

    low_stage = jax.random.normal(k_low, (N, Cl, H, W), jnp.float32)
    high_stage = jax.random.normal(k_high, (N, Ch, Hh, Wh), jnp.float32)
    params = init_saf_params(k_par, Cl, Ch, r=4)

    out = jax.block_until_ready(saf_forward(high_stage, low_stage, params, tn=512))
    ref = jax.block_until_ready(saf_reference(high_stage, low_stage, params))

    assert out.shape == (N, Cl + Ch, H, W)
    assert bool(jnp.all(jnp.isfinite(out)))
    max_err = float(jnp.max(jnp.abs(out - ref)))
    assert max_err < 5e-2, f"kernel/reference mismatch: {max_err}"
    print("KERNEL_OK")
</pallas_src>

<mosaic_0001>
module attributes {stable_mosaic.version = 11 : i64} {
  func.func @saf_kernel(%arg0: i32, %arg1: i32, %arg2: memref<1x8x256xf32, #tpu.memory_space<vmem>>, %arg3: memref<1x8x256xf32, #tpu.memory_space<vmem>>, %arg4: memref<4x8xf32, #tpu.memory_space<vmem>>, %arg5: memref<4x8xf32, #tpu.memory_space<vmem>>, %arg6: memref<4x1xf32, #tpu.memory_space<vmem>>, %arg7: memref<16x4xf32, #tpu.memory_space<vmem>>, %arg8: memref<16x1xf32, #tpu.memory_space<vmem>>, %arg9: memref<1x16x256xf32, #tpu.memory_space<vmem>>) attributes {dimension_semantics = [#tpu.dimension_semantics<parallel>, #tpu.dimension_semantics<parallel>], iteration_bounds = array<i64: 2, 1>, scalar_prefetch = 0 : i64, scratch_operands = 0 : i64, tpu.core_type = #tpu.core_type<tc>, window_params = [{transform_indices = @transform_0, window_bounds = array<i64: 1, 8, 256>}, {transform_indices = @transform_1, window_bounds = array<i64: 1, 8, 256>}, {pipeline_mode = #tpu.pipeline_mode<synchronous>, transform_indices = @transform_2, window_bounds = array<i64: 4, 8>}, {pipeline_mode = #tpu.pipeline_mode<synchronous>, transform_indices = @transform_3, window_bounds = array<i64: 4, 8>}, {pipeline_mode = #tpu.pipeline_mode<synchronous>, transform_indices = @transform_4, window_bounds = array<i64: 4, 1>}, {pipeline_mode = #tpu.pipeline_mode<synchronous>, transform_indices = @transform_5, window_bounds = array<i64: 16, 4>}, {pipeline_mode = #tpu.pipeline_mode<synchronous>, transform_indices = @transform_6, window_bounds = array<i64: 16, 1>}, {transform_indices = @transform_7, window_bounds = array<i64: 1, 16, 256>}]} {
    %c0 = arith.constant 0 : index
    %c0_0 = arith.constant 0 : index
    %c0_1 = arith.constant 0 : index
    %0 = vector.load %arg2[%c0, %c0_0, %c0_1] : memref<1x8x256xf32, #tpu.memory_space<vmem>>, vector<1x8x256xf32>
    %1 = vector.shape_cast %0 : vector<1x8x256xf32> to vector<8x256xf32>
    %c0_2 = arith.constant 0 : index
    %c0_3 = arith.constant 0 : index
    %c0_4 = arith.constant 0 : index
    %2 = vector.load %arg3[%c0_2, %c0_3, %c0_4] : memref<1x8x256xf32, #tpu.memory_space<vmem>>, vector<1x8x256xf32>
    %3 = vector.shape_cast %2 : vector<1x8x256xf32> to vector<8x256xf32>
    %c0_5 = arith.constant 0 : index
    %c0_6 = arith.constant 0 : index
    %4 = vector.load %arg4[%c0_5, %c0_6] : memref<4x8xf32, #tpu.memory_space<vmem>>, vector<4x8xf32>
    %cst = arith.constant dense<0.000000e+00> : vector<4x256xf32>
    %5 = tpu.matmul %4, %1, %cst {dimension_numbers = #tpu.dot_dimension_numbers<[1], [0], [0], [1], [0, 0, 1, 1], [], []>} : vector<4x8xf32>, vector<8x256xf32>, vector<4x256xf32> -> vector<4x256xf32>
    %c0_7 = arith.constant 0 : index
    %c0_8 = arith.constant 0 : index
    %6 = vector.load %arg5[%c0_7, %c0_8] : memref<4x8xf32, #tpu.memory_space<vmem>>, vector<4x8xf32>
    %cst_9 = arith.constant dense<0.000000e+00> : vector<4x256xf32>
    %7 = tpu.matmul %6, %3, %cst_9 {dimension_numbers = #tpu.dot_dimension_numbers<[1], [0], [0], [1], [0, 0, 1, 1], [], []>} : vector<4x8xf32>, vector<8x256xf32>, vector<4x256xf32> -> vector<4x256xf32>
    %8 = arith.addf %5, %7 : vector<4x256xf32>
    %c0_10 = arith.constant 0 : index
    %c0_11 = arith.constant 0 : index
    %9 = vector.load %arg6[%c0_10, %c0_11] : memref<4x1xf32, #tpu.memory_space<vmem>>, vector<4x1xf32>
    %10 = vector.broadcast %9 : vector<4x1xf32> to vector<4x256xf32>
    %11 = arith.addf %8, %10 : vector<4x256xf32>
    %cst_12 = arith.constant 0.000000e+00 : f32
    %12 = vector.broadcast %cst_12 : f32 to vector<4x256xf32>
    %13 = arith.maximumf %11, %12 : vector<4x256xf32>
    %c0_13 = arith.constant 0 : index
    %c0_14 = arith.constant 0 : index
    %14 = vector.load %arg7[%c0_13, %c0_14] : memref<16x4xf32, #tpu.memory_space<vmem>>, vector<16x4xf32>
    %cst_15 = arith.constant dense<0.000000e+00> : vector<16x256xf32>
    %15 = tpu.matmul %14, %13, %cst_15 {dimension_numbers = #tpu.dot_dimension_numbers<[1], [0], [0], [1], [0, 0, 1, 1], [], []>} : vector<16x4xf32>, vector<4x256xf32>, vector<16x256xf32> -> vector<16x256xf32>
    %c0_16 = arith.constant 0 : index
    %c0_17 = arith.constant 0 : index
    %16 = vector.load %arg8[%c0_16, %c0_17] : memref<16x1xf32, #tpu.memory_space<vmem>>, vector<16x1xf32>
    %17 = vector.broadcast %16 : vector<16x1xf32> to vector<16x256xf32>
    %18 = arith.addf %15, %17 : vector<16x256xf32>
    %cst_18 = arith.constant 0.000000e+00 : f32
    %19 = vector.broadcast %cst_18 : f32 to vector<16x256xf32>
    %20 = arith.subf %19, %18 : vector<16x256xf32>
    %21 = math.exp %20 : vector<16x256xf32>
    %cst_19 = arith.constant 1.000000e+00 : f32
    %22 = vector.broadcast %cst_19 : f32 to vector<16x256xf32>
    %23 = arith.addf %22, %21 : vector<16x256xf32>
    %24 = tpu.reciprocal %23 {approx = true} : vector<16x256xf32> -> vector<16x256xf32>
    %25 = vector.extract_strided_slice %24 {offsets = [0, 0], sizes = [8, 256], strides = [1, 1]} : vector<16x256xf32> to vector<8x256xf32>
    %26 = arith.mulf %1, %25 : vector<8x256xf32>
    %c0_20 = arith.constant 0 : index
    %c0_21 = arith.constant 0 : index
    %c0_22 = arith.constant 0 : index
    %27 = vector.load %arg9[%c0_20, %c0_21, %c0_22] : memref<1x16x256xf32, #tpu.memory_space<vmem>>, vector<1x8x256xf32>
    %28 = vector.shape_cast %27 : vector<1x8x256xf32> to vector<8x256xf32>
    %29 = vector.shape_cast %26 : vector<8x256xf32> to vector<1x8x256xf32>
    tpu.vector_store %arg9[%c0_20, %c0_21, %c0_22], %29 {strides = array<i32>} : memref<1x16x256xf32, #tpu.memory_space<vmem>>, vector<1x8x256xf32>,
    %30 = vector.extract_strided_slice %24 {offsets = [8, 0], sizes = [8, 256], strides = [1, 1]} : vector<16x256xf32> to vector<8x256xf32>
    %31 = arith.mulf %3, %30 : vector<8x256xf32>
    %c0_23 = arith.constant 0 : index
    %c8 = arith.constant 8 : index
    %c0_24 = arith.constant 0 : index
    %32 = vector.load %arg9[%c0_23, %c8, %c0_24] : memref<1x16x256xf32, #tpu.memory_space<vmem>>, vector<1x8x256xf32>
    %33 = vector.shape_cast %32 : vector<1x8x256xf32> to vector<8x256xf32>
    %34 = vector.shape_cast %31 : vector<8x256xf32> to vector<1x8x256xf32>
    tpu.vector_store %arg9[%c0_23, %c8, %c0_24], %34 {strides = array<i32>} : memref<1x16x256xf32, #tpu.memory_space<vmem>>, vector<1x8x256xf32>,
    return
  }
  func.func @transform_0(%arg0: i32, %arg1: i32) -> (i32, i32, i32) {
    %c0_i32 = arith.constant 0 : i32
    %c0_i32_0 = arith.constant 0 : i32
    return %arg0, %c0_i32, %arg1 : i32, i32, i32
  }
  func.func @transform_1(%arg0: i32, %arg1: i32) -> (i32, i32, i32) {
    %c0_i32 = arith.constant 0 : i32
    %c0_i32_0 = arith.constant 0 : i32
    return %arg0, %c0_i32, %arg1 : i32, i32, i32
  }
  func.func @transform_2(%arg0: i32, %arg1: i32) -> (i32, i32) {
    %c0_i32 = arith.constant 0 : i32
    %c0_i32_0 = arith.constant 0 : i32
    %c0_i32_1 = arith.constant 0 : i32
    return %c0_i32, %c0_i32_0 : i32, i32
  }
  func.func @transform_3(%arg0: i32, %arg1: i32) -> (i32, i32) {
    %c0_i32 = arith.constant 0 : i32
    %c0_i32_0 = arith.constant 0 : i32
    %c0_i32_1 = arith.constant 0 : i32
    return %c0_i32, %c0_i32_0 : i32, i32
  }
  func.func @transform_4(%arg0: i32, %arg1: i32) -> (i32, i32) {
    %c0_i32 = arith.constant 0 : i32
    %c0_i32_0 = arith.constant 0 : i32
    %c0_i32_1 = arith.constant 0 : i32
    return %c0_i32, %c0_i32_0 : i32, i32
  }
  func.func @transform_5(%arg0: i32, %arg1: i32) -> (i32, i32) {
    %c0_i32 = arith.constant 0 : i32
    %c0_i32_0 = arith.constant 0 : i32
    %c0_i32_1 = arith.constant 0 : i32
    return %c0_i32, %c0_i32_0 : i32, i32
  }
  func.func @transform_6(%arg0: i32, %arg1: i32) -> (i32, i32) {
    %c0_i32 = arith.constant 0 : i32
    %c0_i32_0 = arith.constant 0 : i32
    %c0_i32_1 = arith.constant 0 : i32
    return %c0_i32, %c0_i32_0 : i32, i32
  }
  func.func @transform_7(%arg0: i32, %arg1: i32) -> (i32, i32, i32) {
    %c0_i32 = arith.constant 0 : i32
    %c0_i32_0 = arith.constant 0 : i32
    return %arg0, %c0_i32, %arg1 : i32, i32, i32
  }
}

</mosaic_0001>

<bundles_post_ra>
// kernel: tpu_custom_call.1
= control target key start
LH: loop header
LB: loop body
LE: loop exit
PB: predicated region body
PF: predicated region fallthrough
CT: control target
= control target key end

     0   :  { %s1217_s0 = inlined_call_operand.vmem [shape: f32[2,8,256], index: 0, kind: input, shape index: {}]   ;;  %s1218_s1 = inlined_call_operand.hbm [shape: f32[2,8,256], index: 1, kind: input, shape index: {}]   ;;  %s1219_s2 = inlined_call_operand.vmem [shape: f32[4,8], index: 2, kind: input, shape index: {}]   ;;  %s1220_s3 = inlined_call_operand.hbm [shape: f32[4,8], index: 3, kind: input, shape index: {}]   ;;  %s1221_s4 = inlined_call_operand.vmem [shape: f32[4,1], index: 4, kind: input, shape index: {}]   ;;  %s1222_s5 = inlined_call_operand.vmem [shape: f32[16,4], index: 5, kind: input, shape index: {}]   ;;  %s1223_s6 = inlined_call_operand.vmem [shape: f32[16,1], index: 6, kind: input, shape index: {}]   ;;  %s1224_s7 = inlined_call_operand.hbm [shape: f32[2,16,256], index: 7, kind: output, shape index: {}]  }
   0x1   :  { %1227 = sst [smem:[#allocation13_spill]] %s1220_s3 }
   0x2   :  { %12 = vsyncpa [#allocation3], 0 }
   0x3   :  { %14 = vsyncpa [#allocation3 + $0x1], 0 }
   0x4   :  { %15 = vsyncpa [#allocation6], 0 }
   0x5   :  { %16 = vsyncpa [#allocation4], 0 }
   0x6   :  { %18 = vsyncpa [#allocation4 + $0x1], 0  ;;  %s1024_s24 = smov 0   ;;  %s1026_s25 = smov 0  }
   0x7   :  { %s1028_s26 = smov 0   ;;  %s1030_s27 = smov 0  }
   0x8   :  { %s1032_s28 = smov 0   ;;  %s1034_s29 = smov 0  }
   0x9 LB: > { %1228 = sst [smem:[#allocation11_spill]] %s958_s24  ;;  %s706_s30 = sadd.s32 4294967295, %s978_s29   ;;  %s978_s29 = sphi %s1034_s29, %s24_s29   ;;  %s974_s28 = sphi %s1032_s28, %s1244_s28   ;;  %s970_s27 = sphi %s1030_s27, %s1243_s27   ;;  %s966_s26 = sphi %s1028_s26, %s1242_s26   ;;  %s962_s25 = sphi %s1026_s25, %s1241_s25   ;;  %s958_s24 = sphi %s1024_s24, %s1240_s24  }
   0xa   : > { %s707_s8 = sadd.s32 4294967294, %s978_s29   ;;  %p86_p0 = scmp.ne.s32.totalorder %s962_s25, %s958_s24 }
   0xb   : > { %p1058_p1 = scmp.eq.s32.totalorder %s706_s30, 0  ;;  %p1062_p2 = scmp.eq.s32.totalorder %s706_s30, 1 }
   0xc   : > { %p223_p3 = scmp.eq.s32.totalorder %s707_s8, 1  ;;  %p708_p5 = scmp.ge.s32.totalorder %s978_s29, 1 }
   0xd   : > { %p1068_p4 = por %p1058_p1, %p86_p0  ;;  %p230_p7 = scmp.lt.s32.totalorder %s978_s29, 3 }
   0xe   : > { %p1073_p6 = por %p223_p3, %p86_p0  ;;  %s1234_s3 = sld [smem:[#allocation13_spill]] }
   0xf   : > { %p1081_p8 = pnand %p708_p5, %p230_p7  ;;  %p710_p9 = scmp.ge.s32.totalorder %s978_s29, 2 }
  0x10   : > { %s1232_s12 = scalar_select %p1073_p6, 1, 0 }
  0x11   : > { %p746_p10 = pneg %p1081_p8  ;;  %s980_s17 = smov [#allocation5]  }
  0x12   : > { %1233 = sst [smem:[#allocation12_spill]] %s1232_s12  ;;  %s247_s18 = sshll.u32 %s980_s17, 4  ;;  %s248_s18 = int_to_ptr.vmem [resolvable:$true] %s247_s18 }
  0x13   : > { %p747_p11 = pnand %p746_p10, %p1058_p1  ;;  %s36_s19 = sadd.s32 1, %s974_s28 }
  0x14   : > { %s245_s15 = sshll.u32 %s1234_s3, 4  ;;  %p38_p12 = scmp.ge.s32.totalorder %s36_s19, 2  ;;  %s246_s15 = int_to_ptr.hbm [resolvable:$true] %s245_s15 }
  0x15   : > { %749 = dma.hbm_to_vmem [thread:$0]  (!%p747_p11), %s246_s15, 64, %s248_s18, [#allocation6]  }
  0x16   : > { %s73_s20 = sadd.s32 1, %s966_s26  ;;  %p80_p13 = scmp.ne.s32.totalorder %s966_s26, %s962_s25 }
  0x17   : > { %p81_p0 = scmp.eq.s32.totalorder %s978_s29, 0  ;;  %s1246_s19 = smov (%p38_p12, %s36_s19), 0 }
  0x18   : > { %p1103_p5 = por %p1062_p2, %p80_p13  ;;  %s68_s23 = ssub.s32 %s974_s28, %s1246_s19 }
  0x19   : > { %p1097_p3 = por %p81_p0, %p80_p13  ;;  %p759_p7 = scmp.lt.s32.totalorder %s978_s29, 2 }
  0x1a   : > { %p71_p10 = scmp.eq.s32.totalorder %s68_s23, 0  ;;  %s280_s30 = sand.u32 1, %s966_s26  }
  0x1b   : > { %s711_s8 = sshll.u32 %s280_s30, 4  ;;  %s735_s14 = sshll.u32 %s974_s28, 4 }
  0x1c   : > { %s1112_s13 = scalar_select %p71_p10, %s966_s26, %s73_s20  }
  0x1d   : > { %s291_s18 = scalar_lea.hbm %s1218_s1, %s735_s14  ;;  %s284_s3 = scalar_lea.vmem [#allocation2], %s711_s8 }
  0x1e   : > { %s295_s12 = sshll.u32 %s284_s3, 4  ;;  %s293_s10 = sshll.u32 %s291_s18, 4  ;;  %s296_s12 = int_to_ptr.vmem [resolvable:$true] %s295_s12  ;;  %s294_s10 = int_to_ptr.hbm [resolvable:$true] %s293_s10 }
  0x1f   : > { %p751_p2 = pnand %p759_p7, %p1097_p3  ;;  %s281_s24 = scalar_lea.sflag [#allocation3], %s280_s30 }
  0x20   : > { %304 = sbr.rel (%p1081_p8) target bundleno = 355 (0x163), region = 48  ;;  %s1123_s20 = sand.u32 (!%p1081_p8), 1, %s962_s25  }
  0x21   : > { %753 = dma.hbm_to_vmem [thread:$0]  (!%p751_p2), %s294_s10, 256, %s296_s12, %s281_s24  }
  0x22   : > { %s715_s23 = sshll.u32 (!%p1081_p8), %s1123_s20, 4  ;;  %s307_s14 = scalar_lea.sflag (!%p1081_p8), [#allocation3], %s1123_s20 }
  0x23   : > { %s310_s8 = scalar_lea.vmem (!%p1081_p8), [#allocation2], %s715_s23 }
  0x25   : > { %945 = dma.done.wait (%p1068_p4), %s307_s14, 256  }
  0x26   : > { %947 = vsyncadd (%p1068_p4), %s307_s14, 4294967040 }
  0x27   : > { %949 = dma.done.wait (%p1058_p1), [#allocation6], 64  }
  0x28   : > { %951 = vsyncadd (%p1058_p1), [#allocation6], 4294967232  ;;  %p357_p8 = scmp.lt.s32.totalorder %s970_s27, 1  ;;  %v981_v0 = vmov 0   ;;  %vm374_vm0 = vcmask 64512   ;;  %v1140_v1 = vld [vmem:[%s310_s8] sm:$0xff] }
  0x29   : > { %814 = vset.pattern.permute.xlu0 %v981_v0  ;;  %815 = vset.pattern.permute.xlu1 %v981_v0  ;;  %v1142_v2 = vld [vmem:[%s310_s8 + $0x8] sm:$0xff]  ;;  %v373_v3 = vld [vmem:[#allocation5] sm:$0xf]  ;;  %vm492_vm1 = vcmask 1043456   ;;  %vm485_vm2 = vcmask 31744   ;;  %s717_s12 = sshll.u32 %s1123_s20, 5 }
  0x2a   : > { %s358_s3 = scalar_select %p357_p8, %s970_s27, 1  ;;  %393 = vmatpush.msra.mxu2 %v1140_v1  ;;  %413 = vmatpush.msra.mxu3 %v1142_v2  ;;  %v461_v6 = vld [vmem:[%s1221_s4] sm:$0xf]  ;;  %v474_v9 = vld [vmem:[%s1223_s6 + $0x8] sm:$0xff] }
  0x2b   : > { %720 = vmatmul.msk.f32.vlgmr.msra.gmra.mxu2 %vm374_vm0, %v373_v3  ;;  %721 = vmatmul.msk.f32.vlgmr.msra.gmra.mxu3 %vm374_vm0, %v373_v3  ;;  %v372_v7 = vld [vmem:[%s1219_s2] sm:$0xf]  ;;  %v472_v22 = vld [vmem:[%s1222_s5 + $0x8] sm:$0xff]  ;;  %s737_s16 = sshll.u32 %s970_s27, 5  ;;  %s574_s27 = scalar_lea.sflag [#allocation4], %s1123_s20 }
  0x2c   : > { %s736_s24 = sshll.u32 %s358_s3, 4  ;;  %464 = vperm.xlu0 %814, %v461_v6   ;;  %v473_v8 = vld [vmem:[%s1223_s6] sm:$0xff]  ;;  %482 = vperm.xlu1 %815, %v474_v9   ;;  %s587_s30 = scalar_lea.hbm %s1224_s7, %s737_s16 }
  0x2d   : > { %s364_s21 = scalar_lea.vmem %s1217_s0, %s736_s24  ;;  %v471_v21 = vld [vmem:[%s1222_s5] sm:$0xff]  ;;  %s590_s17 = sshll.u32 %s587_s30, 4  ;;  %s591_s17 = int_to_ptr.hbm [resolvable:$true] %s590_s17 }
  0x2e   : > { %v1146_v4 = vld [vmem:[%s364_s21] sm:$0xff]  ;;  %v1148_v5 = vld [vmem:[%s364_s21 + $0x8] sm:$0xff]  ;;  %s355_s21 = scalar_lea.vmem [#allocation7], %s717_s12  ;;  %s906_s18 = sshra.s32 %s591_s17, 4  ;;  %s907_s18 = int_to_ptr.hbm [resolvable:$true] %s906_s18 }
  0x2f   : > { %436 = vmatpush.msrb.mxu2 %v1146_v4  ;;  %456 = vmatpush.msrb.mxu3 %v1148_v5  ;;  %s588_s15 = sshll.u32 %s355_s21, 4  ;;  %s908_s10 = scalar_lea.hbm %s907_s18, 32  ;;  %s589_s15 = int_to_ptr.vmem [resolvable:$true] %s588_s15 }
  0x30   : > { %p909_p1 = scmp.ne.s32.totalorder %s907_s18, %s908_s10  ;;  %s912_s8 = scalar_lea.hbm %s1224_s7, 64 }
  0x31   : > { %p913_p12 = scmp.lt.s32.totalorder %s907_s18, %s1224_s7  ;;  %p914_p13 = scmp.lt.s32.totalorder %s912_s8, %s908_s10 }
  0x32   : > { %p910_p4 = pnand %p909_p1, %p1103_p5 }
  0x33   : > { %722 = vmatmul.msk.f32.vlgmr.msrb.gmra.mxu2 %vm374_vm0, %v372_v7  ;;  %723 = vmatmul.msk.f32.vlgmr.msrb.gmra.mxu3 %vm374_vm0, %v372_v7  ;;  %p915_p0 = por %p914_p13, %p913_p12 }
  0x34   : > { %477 = vperm.xlu0 %814, %v473_v8   ;;  %p911_p11 = pneg %p910_p4 }
  0x36   : > { %p916_p3 = pnand %p915_p0, %p911_p11 }
  0x9e   : > { %v465_v16 = vpop.permute.xlu0 %464  ;;  %v483_v32 = vpop.permute.xlu1 %482 }
  0xa6   : > { %v478_v23 = vpop.permute.xlu0 %477 }
  0xae   : > { %v395_v10 = vpop.f32.mrf.mxu2  ;;  %v415_v11 = vpop.f32.mrf.mxu3 }
  0xb6   : > { %v438_v12 = vpop.f32.mrf.mxu2  ;;  %v458_v13 = vpop.f32.mrf.mxu3 }
  0xb7   : > { %v439_v14 = vadd.f32 %v438_v12, %v395_v10  ;;  %v459_v15 = vadd.f32 %v458_v13, %v415_v11 }
  0xb9   : > { %v467_v17 = vadd.f32 %v465_v16, %v439_v14  ;;  %v468_v18 = vadd.f32 %v465_v16, %v459_v15 }
  0xbb   : > { %v469_v19 = vmax.f32 %v467_v17, 0.0  ;;  %v470_v20 = vmax.f32 %v468_v18, 0.0 }
  0xbd   : > { %724 = vmatpush.msk.msra.mxu0 %vm492_vm1, %v469_v19  ;;  %727 = vmatpush.msk.msra.mxu1 %vm492_vm1, %v470_v20 }
  0xbe   : > { %725 = vmatmul.msk.f32.vlgmr.msra.gmra.mxu0 %vm485_vm2, %v471_v21  ;;  %728 = vmatmul.msk.f32.vlgmr.msra.gmra.mxu1 %vm485_vm2, %v471_v21 }
  0xc6   : > { %726 = vmatmul.msk.f32.gmra.mxu0 %vm485_vm2, %v472_v22  ;;  %729 = vmatmul.msk.f32.gmra.mxu1 %vm485_vm2, %v472_v22 }
 0x13b   : > { %v516_v24 = vpop.f32.mrf.mxu0  ;;  %v539_v25 = vpop.f32.mrf.mxu1 }
 0x13c   : > { %v517_v26 = vadd.f32 %v516_v24, %v478_v23  ;;  %v540_v27 = vadd.f32 %v539_v25, %v478_v23 }
 0x13e   : > { %v545_v28 = vsub.f32 0.0, %v517_v26  ;;  %v546_v29 = vsub.f32 0.0, %v540_v27 }
 0x140   : > { %v549_v30 = vmul.f32 1.442695, %v545_v28  ;;  %v551_v31 = vmul.f32 1.442695, %v546_v29 }
 0x142   : > { %816 = vpow2.f32 %v549_v30 }
 0x143   : > { %818 = vpow2.f32 %v551_v31  ;;  %v519_v33 = vpop.f32.mrf.mxu0  ;;  %v542_v34 = vpop.f32.mrf.mxu1 }
 0x144   : > { %v520_v35 = vadd.f32 %v519_v33, %v483_v32  ;;  %v543_v36 = vadd.f32 %v542_v34, %v483_v32 }
 0x146   : > { %v547_v37 = vsub.f32 0.0, %v520_v35  ;;  %v548_v38 = vsub.f32 0.0, %v543_v36 }
 0x148   : > { %v817_v39 = vpop.eup %816  ;;  %v553_v40 = vmul.f32 1.442695, %v547_v37  ;;  %v555_v43 = vmul.f32 1.442695, %v548_v38 }
 0x149   : > { %v819_v41 = vpop.eup %818  ;;  %v557_v42 = vadd.f32 1.0, %v817_v39 }
 0x14a   : > { %v558_v44 = vadd.f32 1.0, %v819_v41  ;;  %820 = vpow2.f32 %v553_v40 }
 0x14b   : > { %822 = vrcp.f32 %v557_v42 }
 0x14c   : > { %824 = vrcp.f32 %v558_v44 }
 0x14d   : > { %826 = vpow2.f32 %v555_v43 }
 0x150   : > { %v821_v45 = vpop.eup %820 }
 0x151   : > { %v823_v46 = vpop.eup %822  ;;  %v559_v47 = vadd.f32 1.0, %v821_v45 }
 0x152   : > { %v825_v48 = vpop.eup %824  ;;  %v565_v49 = vmul.f32 %v823_v46, %v1146_v4 }
 0x153   : > { %v827_v50 = vpop.eup %826  ;;  %v566_v51 = vmul.f32 %v825_v48, %v1148_v5  ;;  %828 = vrcp.f32 %v559_v47 }
 0x154   : > { %567 = vst [vmem:[%s355_s21] sm:$0xff] %v565_v49  ;;  %v560_v52 = vadd.f32 1.0, %v827_v50 }
 0x155   : > { %568 = vst [vmem:[%s355_s21 + $0x8] sm:$0xff] %v566_v51 }
 0x156   : > { %830 = vrcp.f32 %v560_v52 }
 0x159   : > { %v829_v53 = vpop.eup %828 }
 0x15a   : > { %v569_v54 = vmul.f32 %v829_v53, %v1140_v1 }
 0x15c   : > { %v831_v55 = vpop.eup %830  ;;  %571 = vst [vmem:[%s355_s21 + $0x10] sm:$0xff] %v569_v54 }
 0x15d   : > { %v570_v56 = vmul.f32 %v831_v55, %v1142_v2 }
 0x15f   : > { %572 = vst [vmem:[%s355_s21 + $0x18] sm:$0xff] %v570_v56 }
 0x160   : > { %919 = shalt.err (!%p916_p3)
}
 0x161   : > { %s982_s20 = smov 256   ;;  %s983_s12 = smov 16  }
 0x162   : > { %744 = dma.vmem_to_hbm [thread:$0]  (%p1103_p5), %s589_s15, 512, %s591_s17, %s574_s27, %s982_s20, %s982_s20, %s983_s12  }
 0x163 PF: > { %s1238_s16 = sld [smem:[#allocation11_spill]]  ;;  %p755_p7 = pnand %p710_p9, %p1073_p6 }
 0x165   : > { %p756_p10 = pneg %p755_p7 }
 0x169   : > { %s605_s9 = sand.u32 1, %s1238_s16  }
 0x16a   : > { %s606_s11 = scalar_lea.sflag [#allocation4], %s605_s9 }
 0x16b   : > { %953 = dma.done.wait (%p756_p10), %s606_s11, 512  }
 0x16c   : > { %955 = vsyncadd (%p756_p10), %s606_s11, 4294966784  ;;  %s24_s29 = sadd.s32 1, %s978_s29   ;;  %s1240_s24 = smov %s962_s25 }
 0x16d   : > { %p21_p2 = scmp.ge.s32.totalorder %s24_s29, 4   ;;  %s1241_s25 = smov %s966_s26 }
 0x16e   : > { %s1242_s26 = smov %s1112_s13  ;;  %s1243_s27 = smov %s974_s28 }
 0x16f   : > { %s1244_s28 = smov %s1246_s19  ;;  %23 = sbr.rel (!%p21_p2) target bundleno = 9 (0x9), region = 100 }
 0x174   :  { %612 = vsyncpa [#allocation3], 1 }
 0x175   :  { %614 = vsyncpa [#allocation3 + $0x1], 1 }
 0x176   :  { %615 = vsyncpa [#allocation6], 1 }
 0x177   :  { %616 = vsyncpa [#allocation4], 1 }
 0x178   :  { %618 = vsyncpa [#allocation4 + $0x1], 1 }

</bundles_post_ra>
